<compile_context>
chip_gen: v6e
topology: v6e:2x2x1
jax: 0.10.0
libtpu: 0.0.40
codegen_flags: <defaults>
</compile_context>

<pallas_src>
import jax
import jax.numpy as jnp
from jax import lax
from jax.experimental import pallas as pl
from jax.experimental.pallas import tpu as pltpu

VOCAB = 21
VOCAB_PAD = 32          # zero-padded vocab rows -> MXU-friendly K dim
NUM_ADDED = 2
LANE = 128


def prepare_zinc_tables(emb_table):
    """One-time preprocessing, hoisted out of the per-call hot path."""
    emb_table = jnp.asarray(emb_table, jnp.float32)
    emb_dim = emb_table.shape[1]
    table_pad = jnp.zeros((VOCAB_PAD, emb_dim), jnp.float32).at[:VOCAB].set(emb_table)
    # Block-diagonal RHS for the ego path: [[I_2, 0], [0, table_pad]].
    # With LHS = [prefix_f32 | one_hot]:  LHS @ RHS = [prefix_f32 | embedding].
    k = NUM_ADDED + VOCAB_PAD
    out_w = NUM_ADDED + emb_dim
    rhs = jnp.zeros((k, out_w), jnp.float32)
    rhs = rhs.at[:NUM_ADDED, :NUM_ADDED].set(jnp.eye(NUM_ADDED, dtype=jnp.float32))
    rhs = rhs.at[NUM_ADDED:, NUM_ADDED:].set(table_pad)
    return {
        "table_t": table_pad.T,    # (E, VOCAB_PAD)      — plain-policy RHS^T
        "rhs_t": rhs.T,            # (2+E, 2+VOCAB_PAD)  — ego-policy RHS^T
        "emb_dim": emb_dim,
    }


# ----------------------------- kernels (lane-dense, transposed output) -------

def _ego_kernel_t(xt_ref, rhs_t_ref, out_t_ref):
    # xt_ref    : (3, TN) int32  — rows 0..1 = added features, row 2 = atom id
    # rhs_t_ref : (2+E, 2+VOCAB_PAD) f32, resident across the grid
    # out_t_ref : (2+E, TN) f32  (lane-dense along TN)
    xt = xt_ref[...]
    tn = xt.shape[1]
    k = NUM_ADDED + VOCAB_PAD
    row = lax.broadcasted_iota(jnp.int32, (k, tn), 0)
    # rows >= NUM_ADDED : one-hot of the atom index (shifted by NUM_ADDED)
    lhs_t = (row - NUM_ADDED == xt[NUM_ADDED:NUM_ADDED + 1, :]).astype(jnp.float32)
    # rows <  NUM_ADDED : prefix values, int32 -> f32 (VPU filler under DMA)
    for j in range(NUM_ADDED):                       # unrolled at trace time
        lhs_t = jnp.where(row == j, xt[j:j + 1, :].astype(jnp.float32), lhs_t)
    # One MXU matmul + one full, unmasked lane-dense store per block.
    out_t_ref[...] = jnp.dot(rhs_t_ref[...], lhs_t,
                             preferred_element_type=jnp.float32)


def _embed_kernel_t(idt_ref, table_t_ref, out_t_ref):
    # idt_ref     : (1, TN) int32
    # table_t_ref : (E, VOCAB_PAD) f32, resident across the grid
    # out_t_ref   : (E, TN) f32
    ids = idt_ref[...]
    tn = ids.shape[1]
    onehot_t = (lax.broadcasted_iota(jnp.int32, (VOCAB_PAD, tn), 0) == ids
                ).astype(jnp.float32)
    out_t_ref[...] = jnp.dot(table_t_ref[...], onehot_t,
                             preferred_element_type=jnp.float32)


# ----------------------------- wrapper ---------------------------------------

def _pick_tile(n, tile_n):
    """Lane-aligned row tile; keep >= 2 grid blocks when there is enough work
    (so v7x's two TensorCores both get blocks under "parallel" semantics)."""
    tile_req = max(LANE, (int(tile_n) // LANE) * LANE)
    n_ru = ((n + LANE - 1) // LANE) * LANE
    half = (n_ru // 2 // LANE) * LANE
    if half >= LANE:
        tile = min(tile_req, half)
    else:
        tile = min(tile_req, n_ru)       # tiny input: single 128-row block
    return max(tile, LANE)


def _vmem_limit(in_bytes, out_bytes, tmp_bytes):
    # 2x streamed blocks (double buffering) + in-kernel one-hot temporary,
    # with margin; clamped to a range safe on v5e/v6e (128 MiB) and v7x (64 MiB).
    est = 2 * in_bytes + 2 * out_bytes + tmp_bytes + (1 << 20)
    return int(min(48 << 20, max(32 << 20, 2 * est)))


def zinc_atom_encoder(x, emb_table, policy, *, tile_n=8192, tables=None,
                      transposed_output=False):
    """x: int [N, F] (F >= 3 for 'ego_nets_plus', F == 1 or [N] otherwise).

    emb_table: float [21, emb_dim].  Pass `tables=prepare_zinc_tables(...)`
    to avoid rebuilding the padded / block-diagonal tables on every call.
    Returns float32 [N, 2+emb_dim] (ego) or [N, emb_dim]; if
    `transposed_output=True` the (out_w, N) lane-major slab is returned
    directly and the wrapper-side transpose back is skipped.
    """
    if tables is None:
        tables = prepare_zinc_tables(emb_table)
    emb_dim = tables["emb_dim"]

    x = jnp.asarray(x, jnp.int32).reshape(x.shape[0], -1)
    n = x.shape[0]

    tile = _pick_tile(n, tile_n)
    n_blocks = pl.cdiv(n, tile)
    n_pad = n_blocks * tile

    ego = (policy == "ego_nets_plus")
    if ego:
        x = x[:, :NUM_ADDED + 1]                 # (N, 3)
        out_w = NUM_ADDED + emb_dim
        rhs_t = tables["rhs_t"]
        kernel = _ego_kernel_t
    else:
        x = x[:, :1]                             # (N, 1) atom id
        out_w = emb_dim
        rhs_t = tables["table_t"]
        kernel = _embed_kernel_t

    # Lane-dense streaming layout: node axis on the 128-lane minor dimension.
    # Padded rows use atom id 0 (valid) and are sliced off at the end.
    xt = jnp.pad(x, ((0, n_pad - n), (0, 0))).T  # (F, n_pad) int32
    f = xt.shape[0]

    in_bytes = 8 * tile * 4                               # (F,tile) sublane-padded
    out_bytes = ((out_w + 7) // 8) * 8 * tile * 4         # (out_w,tile) f32
    tmp_bytes = ((NUM_ADDED + VOCAB_PAD + 7) // 8) * 8 * tile * 4
    params = pltpu.CompilerParams(
        dimension_semantics=("parallel",),
        vmem_limit_bytes=_vmem_limit(in_bytes, out_bytes, tmp_bytes),
    )

    out_t = pl.pallas_call(
        kernel,
        out_shape=jax.ShapeDtypeStruct((out_w, n_pad), jnp.float32),
        grid=(n_blocks,),
        in_specs=[
            pl.BlockSpec((f, tile), lambda i: (0, i)),
            pl.BlockSpec(rhs_t.shape, lambda i: (0, 0)),   # resident table
        ],
        out_specs=pl.BlockSpec((out_w, tile), lambda i: (0, i)),
        compiler_params=params,
    )(xt, rhs_t)

    if transposed_output:
        return out_t[:, :n]
    # One extra XLA layout pass back to the torch row-major layout; still a net
    # win vs ~27% lane utilization of masked row-major stores when out_w < 128.
    return out_t.T[:n]


# ----------------------------- reference & test ------------------------------

def _reference(x, emb_table, policy):
    x = jnp.asarray(x, jnp.int32).reshape(x.shape[0], -1)
    if policy == "ego_nets_plus":
        emb = emb_table[x[:, NUM_ADDED]]
        return jnp.concatenate([x[:, :NUM_ADDED].astype(jnp.float32), emb], axis=1)
    return emb_table[x[:, 0]]


if __name__ == "__main__":
    key = jax.random.PRNGKey(0)
    k_tab, k_idx, k_pre, k_idx2, k_pre2 = jax.random.split(key, 5)

    emb_dim = 32
    n_nodes = 50            # not a lane multiple: exercises row padding

    # Deterministic "Embedding(21, emb_dim)" weights (nn.Embedding ~ N(0,1)).
    emb_table = jax.random.normal(k_tab, (VOCAB, emb_dim), jnp.float32)
    tables = prepare_zinc_tables(emb_table)

    # ego_nets_plus input: [N, 3] = 2 added integer columns + 1 atom-type index
    atom_ids = jax.random.randint(k_idx, (n_nodes, 1), 0, VOCAB, dtype=jnp.int32)
    added = jax.random.randint(k_pre, (n_nodes, NUM_ADDED), 0, 2, dtype=jnp.int32)
    x_ego = jnp.concatenate([added, atom_ids], axis=1)
    x_plain = atom_ids                                   # default policy: [N, 1]

    out_ego = jax.block_until_ready(
        zinc_atom_encoder(x_ego, emb_table, "ego_nets_plus", tables=tables))
    out_plain = jax.block_until_ready(
        zinc_atom_encoder(x_plain, emb_table, "original", tables=tables))

    ref_ego = _reference(x_ego, emb_table, "ego_nets_plus")
    ref_plain = _reference(x_plain, emb_table, "original")

    assert out_ego.shape == (n_nodes, NUM_ADDED + emb_dim)
    assert out_plain.shape == (n_nodes, emb_dim)
    assert jnp.allclose(out_ego, ref_ego, atol=1e-5, rtol=1e-5)
    assert jnp.allclose(out_plain, ref_plain, atol=1e-5, rtol=1e-5)

    # Multi-block grid: several 128-row tiles plus a ragged tail.
    n_big = 300
    ids_big = jax.random.randint(k_idx2, (n_big, 1), 0, VOCAB, dtype=jnp.int32)
    added_big = jax.random.randint(k_pre2, (n_big, NUM_ADDED), 0, 2, dtype=jnp.int32)
    x_big = jnp.concatenate([added_big, ids_big], axis=1)
    out_big = jax.block_until_ready(
        zinc_atom_encoder(x_big, emb_table, "ego_nets_plus",
                          tile_n=128, tables=tables))
    assert jnp.allclose(out_big, _reference(x_big, emb_table, "ego_nets_plus"),
                        atol=1e-5, rtol=1e-5)

    # Lane-major (transposed) output path, for consumers that can take it.
    out_t = jax.block_until_ready(
        zinc_atom_encoder(x_ego, emb_table, "ego_nets_plus", tables=tables,
                          transposed_output=True))
    assert out_t.shape == (NUM_ADDED + emb_dim, n_nodes)
    assert jnp.allclose(out_t.T, ref_ego, atol=1e-5, rtol=1e-5)

    print("KERNEL_OK")
</pallas_src>

<mosaic_0001>
module attributes {stable_mosaic.version = 11 : i64} {
  func.func @_ego_kernel_t(%arg0: i32, %arg1: memref<3x128xi32, #tpu.memory_space<vmem>>, %arg2: memref<34x34xf32, #tpu.memory_space<vmem>>, %arg3: memref<34x128xf32, #tpu.memory_space<vmem>>) attributes {dimension_semantics = [#tpu.dimension_semantics<parallel>], iteration_bounds = array<i64: 1>, scalar_prefetch = 0 : i64, scratch_operands = 0 : i64, tpu.core_type = #tpu.core_type<tc>, window_params = [{transform_indices = @transform_0, window_bounds = array<i64: 3, 128>}, {pipeline_mode = #tpu.pipeline_mode<synchronous>, transform_indices = @transform_1, window_bounds = array<i64: 34, 34>}, {transform_indices = @transform_2, window_bounds = array<i64: 34, 128>}]} {
    %c0 = arith.constant 0 : index
    %c0_0 = arith.constant 0 : index
    %0 = vector.load %arg1[%c0, %c0_0] : memref<3x128xi32, #tpu.memory_space<vmem>>, vector<3x128xi32>
    %1 = tpu.iota {dimensions = array<i32: 0>} : vector<34x128xi32>
    %c2_i32 = arith.constant 2 : i32
    %2 = vector.broadcast %c2_i32 : i32 to vector<34x128xi32>
    %3 = arith.subi %1, %2 : vector<34x128xi32>
    %4 = vector.extract_strided_slice %0 {offsets = [2, 0], sizes = [1, 128], strides = [1, 1]} : vector<3x128xi32> to vector<1x128xi32>
    %5 = vector.broadcast %4 : vector<1x128xi32> to vector<34x128xi32>
    %6 = arith.cmpi eq, %3, %5 : vector<34x128xi32>
    %7 = arith.extui %6 : vector<34x128xi1> to vector<34x128xi32>
    %8 = arith.sitofp %7 : vector<34x128xi32> to vector<34x128xf32>
    %c0_i32 = arith.constant 0 : i32
    %9 = vector.broadcast %c0_i32 : i32 to vector<34x128xi32>
    %10 = arith.cmpi eq, %1, %9 : vector<34x128xi32>
    %11 = vector.extract_strided_slice %0 {offsets = [0, 0], sizes = [1, 128], strides = [1, 1]} : vector<3x128xi32> to vector<1x128xi32>
    %12 = arith.sitofp %11 : vector<1x128xi32> to vector<1x128xf32>
    %13 = vector.shape_cast %12 : vector<1x128xf32> to vector<1x128xf32>
    %14 = vector.broadcast %13 : vector<1x128xf32> to vector<34x128xf32>
    %15 = arith.select %10, %14, %8 : vector<34x128xi1>, vector<34x128xf32>
    %c1_i32 = arith.constant 1 : i32
    %16 = vector.broadcast %c1_i32 : i32 to vector<34x128xi32>
    %17 = arith.cmpi eq, %1, %16 : vector<34x128xi32>
    %18 = vector.extract_strided_slice %0 {offsets = [1, 0], sizes = [1, 128], strides = [1, 1]} : vector<3x128xi32> to vector<1x128xi32>
    %19 = arith.sitofp %18 : vector<1x128xi32> to vector<1x128xf32>
    %20 = vector.shape_cast %19 : vector<1x128xf32> to vector<1x128xf32>
    %21 = vector.broadcast %20 : vector<1x128xf32> to vector<34x128xf32>
    %22 = arith.select %17, %21, %15 : vector<34x128xi1>, vector<34x128xf32>
    %c0_1 = arith.constant 0 : index
    %c0_2 = arith.constant 0 : index
    %23 = vector.load %arg2[%c0_1, %c0_2] : memref<34x34xf32, #tpu.memory_space<vmem>>, vector<34x34xf32>
    %cst = arith.constant dense<0.000000e+00> : vector<34x128xf32>
    %24 = tpu.matmul %23, %22, %cst {dimension_numbers = #tpu.dot_dimension_numbers<[1], [0], [0], [1], [0, 0, 1, 1], [], []>} : vector<34x34xf32>, vector<34x128xf32>, vector<34x128xf32> -> vector<34x128xf32>
    %c0_3 = arith.constant 0 : index
    %c0_4 = arith.constant 0 : index
    %25 = vector.load %arg3[%c0_3, %c0_4] : memref<34x128xf32, #tpu.memory_space<vmem>>, vector<34x128xf32>
    tpu.vector_store %arg3[%c0_3, %c0_4], %24 {strides = array<i32>} : memref<34x128xf32, #tpu.memory_space<vmem>>, vector<34x128xf32>,
    return
  }
  func.func @transform_0(%arg0: i32) -> (i32, i32) {
    %c0_i32 = arith.constant 0 : i32
    %c0_i32_0 = arith.constant 0 : i32
    return %c0_i32, %arg0 : i32, i32
  }
  func.func @transform_1(%arg0: i32) -> (i32, i32) {
    %c0_i32 = arith.constant 0 : i32
    %c0_i32_0 = arith.constant 0 : i32
    %c0_i32_1 = arith.constant 0 : i32
    return %c0_i32, %c0_i32_0 : i32, i32
  }
  func.func @transform_2(%arg0: i32) -> (i32, i32) {
    %c0_i32 = arith.constant 0 : i32
    %c0_i32_0 = arith.constant 0 : i32
    return %c0_i32, %arg0 : i32, i32
  }
}

</mosaic_0001>

<bundles_post_ra>
// kernel: tpu_custom_call.1
= control target key start
LH: loop header
LB: loop body
LE: loop exit
PB: predicated region body
PF: predicated region fallthrough
CT: control target
= control target key end

     0   :  { %7 = vsyncpa [#allocation3], 0  ;;  %s439_s0 = inlined_call_operand.hbm [shape: s32[3,128], index: 0, kind: input, shape index: {}]   ;;  %s440_s1 = inlined_call_operand.hbm [shape: f32[34,34], index: 1, kind: input, shape index: {}]   ;;  %s441_s2 = inlined_call_operand.hbm [shape: f32[34,128], index: 2, kind: output, shape index: {}]  }
   0x1   :  { %8 = vsyncpa [#allocation6], 0 }
   0x2   :  { %9 = vsyncpa [#allocation4], 0  ;;  %s374_s9 = smov [#allocation2]   ;;  %s375_s11 = smov [#allocation5]  }
   0x3   :  { %s16_s10 = sshll.u32 %s374_s9, 4  ;;  %s25_s12 = sshll.u32 %s375_s11, 4  ;;  %s17_s10 = int_to_ptr.vmem [resolvable:$true] %s16_s10  ;;  %s26_s12 = int_to_ptr.vmem [resolvable:$true] %s25_s12 }
   0x4   :  { %s316_s13 = scalar_lea.vmem %s17_s10, 64  ;;  %p321_p1 = scmp.lt.s32.totalorder %s17_s10, %s17_s10 }
   0x5   :  { %p317_p0 = scmp.ne.s32.totalorder %s17_s10, %s316_s13  ;;  %p322_p2 = scmp.lt.s32.totalorder %s316_s13, %s316_s13 }
   0x7   :  { %p323_p3 = por %p322_p2, %p321_p1 }
   0x9   :  { %p324_p4 = pnand %p323_p3, %p317_p0 }
   0xb   :  { %327 = shalt.err (!%p324_p4)
}
   0xc   :  { %19 = dma.hbm_to_vmem [thread:$0]  %s439_s0, 64, %s17_s10, [#allocation3]  }
   0xd   :  { %s336_s16 = scalar_lea.vmem %s26_s12, 640  ;;  %p341_p6 = scmp.lt.s32.totalorder %s26_s12, %s26_s12 }
   0xe   :  { %p337_p5 = scmp.ne.s32.totalorder %s26_s12, %s336_s16  ;;  %p342_p7 = scmp.lt.s32.totalorder %s336_s16, %s336_s16 }
  0x10   :  { %p343_p8 = por %p342_p7, %p341_p6 }
  0x12   :  { %p344_p9 = pnand %p343_p8, %p337_p5 }
  0x14   :  { %347 = shalt.err (!%p344_p9)
}
  0x15   :  { %s376_s17 = smov 128   ;;  %s377_s18 = smov 8  }
  0x16   :  { %31 = dma.hbm_to_vmem [thread:$0]  %s440_s1, 640, %s26_s12, [#allocation6], %s376_s17, %s376_s17, %s377_s18  }
  0x17   :  { %368 = dma.done.wait [#allocation3], 64  }
  0x18   :  { %369 = vsyncadd [#allocation3], 4294967232 }
  0x19   :  { %370 = dma.done.wait [#allocation6], 640  }
  0x1a   :  { %371 = vsyncadd [#allocation6], 4294966656  ;;  %v39_v0 = vlaneseq  ;;  %v378_v1 = vmov 0.0   ;;  %vm379_vm0 = vmmov 0   ;;  %v38_v9 = vld [vmem:[#allocation2] sm:$0x7] }
  0x1b   :  { %265 = vmatprep.subr.mxu0 %v378_v1  ;;  %290 = vmatprep.subr.mxu1 %v378_v1  ;;  %v74_v14 = vcvt.s32.f32 %v38_v9  ;;  %vm119_vm1 = vcmask 1041408   ;;  %v380_v22 = vmov 1.0   ;;  %v98_v25 = vld [vmem:[#allocation5] sm:$0xff]  ;;  %vm103_vm9 = vcmask 277504   ;;  %v101_v26 = vld [vmem:[#allocation5 + $0x18] sm:$0xff]  ;;  %v99_v27 = vld [vmem:[#allocation5 + $0x8] sm:$0xff] }
  0x1c   :  { %v40_v2 = vshrl.u32 %v39_v0, 7  ;;  %275 = vmatprep.mubr.msk.f32.mxu0 %vm379_vm0, %v378_v1  ;;  %284 = vmatprep.mubr.msk.f32.mxu1 %vm379_vm0, %v378_v1  ;;  %v102_v28 = vld [vmem:[#allocation5 + $0x20] sm:$0x3]  ;;  %v100_v29 = vld [vmem:[#allocation5 + $0x10] sm:$0xff]  ;;  %s381_s0 = smov [#allocation7]  }
  0x1d   :  { %s223_s1 = sshll.u32 %s381_s0, 4  ;;  %s224_s1 = int_to_ptr.vmem [resolvable:$true] %s223_s1 }
  0x1e   :  { %v44_v3 = vadd.s32 32, %v40_v2  ;;  %v52_v4 = vsub.s32 2, %v40_v2  ;;  %v43_v5 = vadd.s32 24, %v40_v2  ;;  %v42_v6 = vadd.s32 16, %v40_v2  ;;  %s348_s21 = scalar_lea.vmem %s224_s1, 640  ;;  %p353_p11 = scmp.lt.s32.totalorder %s224_s1, %s224_s1 }
  0x1f   :  { %v41_v8 = vadd.s32 8, %v40_v2  ;;  %v236_v11 = vadd.s32 4294967294, %v40_v2  ;;  %v77_v12 = vsub.s32 0, %v40_v2  ;;  %v91_v16 = vsub.s32 1, %v40_v2  ;;  %p349_p10 = scmp.ne.s32.totalorder %s224_s1, %s348_s21  ;;  %p354_p12 = scmp.lt.s32.totalorder %s348_s21, %s348_s21 }
  0x20   :  { %v240_v7 = vadd.s32 4294967294, %v44_v3  ;;  %v239_v10 = vadd.s32 4294967294, %v43_v5  ;;  %v53_v13 = vrot.slane %v38_v9, %v52_v4  ;;  %v238_v15 = vadd.s32 4294967294, %v42_v6 }
  0x21   :  { %v237_v17 = vadd.s32 4294967294, %v41_v8  ;;  %vm69_vm3 = vcmp.eq.s32.totalorder %v40_v2, 0  ;;  %v78_v19 = vrot.slane %v74_v14, %v77_v12  ;;  %v92_v21 = vrot.slane %v74_v14, %v91_v16  ;;  %p355_p13 = por %p354_p12, %p353_p11 }
  0x22   :  { %vm58_vm2 = vcmp.eq.s32.totalorder %v240_v7, %v53_v13  ;;  %vm57_vm4 = vcmp.eq.s32.totalorder %v239_v10, %v53_v13  ;;  %vm54_vm5 = vcmp.eq.s32.totalorder %v236_v11, %v53_v13  ;;  %vm56_vm6 = vcmp.eq.s32.totalorder %v238_v15, %v53_v13 }
  0x23   :  { %v245_v18 = vsel %vm58_vm2, 1.0, %v378_v1  ;;  %v241_v20 = vsel %vm54_vm5, 1.0, %v378_v1  ;;  %vm84_vm7 = vcmp.eq.s32.totalorder %v40_v2, 1  ;;  %vm55_vm8 = vcmp.eq.s32.totalorder %v237_v17, %v53_v13  ;;  %p356_p0 = pnand %p355_p13, %p349_p10 }
  0x24   :  { %266 = vmatpush3.msk.msra.mxu0 %vm119_vm1, %v245_v18  ;;  %295 = vmatpush3.msk.msra.mxu1 %vm119_vm1, %v245_v18  ;;  %v79_v23 = vsel %vm69_vm3, %v78_v19, %v241_v20 }
  0x25   :  { %267 = vmatprep.subr.mxu0 %v378_v1  ;;  %291 = vmatprep.subr.mxu1 %v378_v1  ;;  %v93_v24 = vsel %vm84_vm7, %v92_v21, %v79_v23 }
  0x26   :  { %268 = vmatpush3.msk.msra.mxu0 %vm57_vm4, %v380_v22  ;;  %296 = vmatpush3.msk.msra.mxu1 %vm57_vm4, %v380_v22 }
  0x27   :  { %269 = vmatprep.subr.mxu0 %v378_v1  ;;  %292 = vmatprep.subr.mxu1 %v378_v1 }
  0x28   :  { %270 = vmatpush3.msk.msra.mxu0 %vm56_vm6, %v380_v22  ;;  %297 = vmatpush3.msk.msra.mxu1 %vm56_vm6, %v380_v22 }
  0x29   :  { %271 = vmatprep.subr.mxu0 %v378_v1  ;;  %293 = vmatprep.subr.mxu1 %v378_v1 }
  0x2a   :  { %272 = vmatpush3.msk.msra.mxu0 %vm55_vm8, %v380_v22  ;;  %298 = vmatpush3.msk.msra.mxu1 %vm55_vm8, %v380_v22 }
  0x2b   :  { %273 = vmatprep.subr.mxu0 %v378_v1  ;;  %294 = vmatprep.subr.mxu1 %v378_v1 }
  0x2c   :  { %274 = vmatpush3.msra.mxu0 %v93_v24  ;;  %299 = vmatpush3.msra.mxu1 %v93_v24 }
  0x2d   :  { %276 = vmatmul.mubr.msk.f32.vlgmr.msra.gmra.mxu0 %vm103_vm9, %v98_v25  ;;  %285 = vmatmul.mubr.msk.f32.vlgmr.msra.gmra.mxu1 %vm103_vm9, %v101_v26 }
  0x2e   :  { %278 = vmatprep.mubr.msk.f32.mxu0 %vm379_vm0, %v378_v1  ;;  %287 = vmatprep.mubr.msk.f32.mxu1 %vm379_vm0, %v378_v1 }
  0x31   :  { %279 = vmatmul.mubr.msk.f32.gmra.mxu0 %vm103_vm9, %v99_v27  ;;  %288 = vmatmul.mubr.msk.f32.gmra.mxu1 %vm103_vm9, %v102_v28 }
  0x32   :  { %281 = vmatprep.mubr.msk.f32.mxu0 %vm379_vm0, %v378_v1 }
  0x35   :  { %282 = vmatmul.mubr.msk.f32.gmra.mxu0 %vm103_vm9, %v100_v29 }
  0xed   :  { %v189_v30 = vpop.f32.mrf.mxu0  ;;  %v204_v31 = vpop.f32.mrf.mxu1 }
  0xee   :  { %213 = vst [vmem:[#allocation7] sm:$0xff] %v189_v30  ;;  %216 = vst [vmem:[#allocation7 + $0x18] sm:$0xff] %v204_v31 }
  0xef   :  { %v277_v32 = vpop.f32.mrf.mxu0  ;;  %v286_v33 = vpop.f32.mrf.mxu1 }
  0xf1   :  { %v194_v34 = vpop.f32.mrf.mxu0  ;;  %v209_v35 = vpop.f32.mrf.mxu1 }
  0xf2   :  { %214 = vst [vmem:[#allocation7 + $0x8] sm:$0xff] %v194_v34  ;;  %217 = vst [vmem:[#allocation7 + $0x20] sm:$0x3] %v209_v35 }
  0xf3   :  { %v280_v36 = vpop.f32.mrf.mxu0  ;;  %v289_v37 = vpop.f32.mrf.mxu1 }
  0xf5   :  { %v199_v38 = vpop.f32.mrf.mxu0 }
  0xf6   :  { %215 = vst [vmem:[#allocation7 + $0x10] sm:$0xff] %v199_v38 }
  0xf7   :  { %v283_v39 = vpop.f32.mrf.mxu0 }
  0xf8   :  { %359 = shalt.err (!%p356_p0)
}
  0xf9   :  { %229 = dma.vmem_to_hbm [thread:$0]  %s224_s1, 640, %s441_s2, [#allocation4], %s376_s17, %s376_s17, %s377_s18  }
  0xfa   :  { %372 = dma.done.wait [#allocation4], 640  }
  0xfb   :  { %373 = vsyncadd [#allocation4], 4294966656 }
  0xfc   :  { %233 = vsyncpa [#allocation3], 1 }
  0xfd   :  { %234 = vsyncpa [#allocation6], 1 }
  0xfe   :  { %235 = vsyncpa [#allocation4], 1 }

</bundles_post_ra>
